<compile_context>
chip_gen: v6e
topology: v6e:2x2x1
jax: 0.10.0
libtpu: 0.0.40
codegen_flags: <defaults>
</compile_context>

<pallas_src>
import math

import jax
import jax.numpy as jnp
from jax.experimental import pallas as pl
from jax.experimental.pallas import tpu as pltpu


# ---------------------------------------------------------------------------
# Kernels
# ---------------------------------------------------------------------------

def _router_proj_kernel(x_ref, wr_ref, aall_ref, expand_ref, p_ref):
    """Gate-scaled rank-space projection; one token tile per grid step.

    x_ref      : (tm, in_f)     compute dtype
    wr_ref     : (in_f, E)      router weight, pre-transposed
    aall_ref   : (in_f, E*r)    LoRA A stacked over experts, pre-transposed
    expand_ref : (E, E*r)       f32 one-hot gate-expansion matrix (scale folded in)
    p_ref      : (tm, E*r)      f32 output: (x @ A_all) * repeat(scale*gates, r)
    """
    x = x_ref[...]
    logits = jnp.dot(x, wr_ref[...], preferred_element_type=jnp.float32)      # (tm, E)
    m = jnp.max(logits, axis=-1, keepdims=True)
    ex = jnp.exp(logits - m)
    # approx=False keeps exact fp32 gate numerics (op is only (tm, 1)).
    gates = ex * pl.reciprocal(jnp.sum(ex, axis=-1, keepdims=True), approx=False)
    # proj = x @ A_all^T  -> (tm, E*r): one matmul covers all experts.
    proj = jnp.dot(x, aall_ref[...], preferred_element_type=jnp.float32)
    # Expand gates to rank space (each gate repeated r times, scale folded in) via
    # a tiny one-hot matmul -> (tm, E*r); gate multiply stays in rank space (f32).
    g_rep = jnp.dot(gates, expand_ref[...], preferred_element_type=jnp.float32)
    p_ref[...] = proj * g_rep


def _base_plus_lora_kernel(x_ref, wb_ref, bias_ref, ball_ref, proj_ref, o_ref):
    """Grid = (out_f tiles j [outer], token tiles i [inner]).

    x_ref    : (tm, in_f)     compute dtype
    wb_ref   : (in_f, tn)     base weight, pre-transposed (canonical MXU feed)
    bias_ref : (1, tn)        f32
    ball_ref : (E*r, tn)      f32 LoRA B, pre-arranged
    proj_ref : (tm, E*r)      f32 gate-scaled rank projection (from pre-pass)
    o_ref    : (tm, tn)
    """
    acc = jnp.dot(x_ref[...], wb_ref[...], preferred_element_type=jnp.float32)
    acc = acc + bias_ref[...]
    acc = acc + jnp.dot(proj_ref[...], ball_ref[...],
                        preferred_element_type=jnp.float32)
    o_ref[...] = acc.astype(o_ref.dtype)


# ---------------------------------------------------------------------------
# Tile selection / VMEM budgeting
# ---------------------------------------------------------------------------

def _round_up(v: int, m: int) -> int:
    return ((v + m - 1) // m) * m


def _vmem_capacity_bytes() -> int:
    try:
        info = pltpu.get_tpu_info()
        cap = int(getattr(info, "vmem_capacity_bytes", 0))
        if cap > 0:
            return cap
    except Exception:
        pass
    return 64 << 20   # conservative fallback (v7x physical per-TC VMEM)


def _main_kernel_vmem_bytes(tm, tn, in_f, rank_cols, cd_bytes, out_bytes):
    """Double-buffered estimate, incl. (8,128) padding of the small blocks."""
    wb = 2 * in_f * tn * cd_bytes
    x = 2 * tm * in_f * cd_bytes
    o = 2 * tm * max(tn, 128) * out_bytes
    proj = 2 * tm * _round_up(rank_cols, 128) * 4
    ball = 2 * _round_up(rank_cols, 8) * max(tn, 128) * 4
    bias = 2 * 8 * max(tn, 128) * 4
    return wb + x + o + proj + ball + bias


def _select_tiles(n_tok, out_f, in_f, rank_cols, cd_bytes, out_bytes, budget,
                  tm_req=None, tn_req=None):
    tm_cap = max(8, min(256, _round_up(n_tok, 8)))
    if tm_req is not None:
        tm_cands = [tm_req]
    else:
        tm_cands = [t for t in (256, 128) if t <= tm_cap] or [tm_cap]
    if tn_req is not None:
        tn_cands = [tn_req]
    else:
        # ">=" so out_f == 512/256 gets the full-width lane-dense tile.
        tn_cands = [c for c in (512, 256, 128) if out_f >= c and out_f % c == 0]
        if not tn_cands:
            tn_cands = [out_f]   # lane-sparse fallback when out_f % 128 != 0
    for tn in tn_cands:          # prefer widest lane-dense output tile
        for tm in tm_cands:      # then the largest token tile that fits VMEM
            if _main_kernel_vmem_bytes(tm, tn, in_f, rank_cols, cd_bytes,
                                       out_bytes) <= budget:
                return tm, tn
    return tm_cands[-1], tn_cands[-1]   # best effort (smallest candidates)


# ---------------------------------------------------------------------------
# Wrappers
# ---------------------------------------------------------------------------

def prepare_moe_lora_params(w_base, b_base, w_router, A, B, *, scale,
                            compute_dtype=jnp.bfloat16):
    """One-time weight preparation (cast + transpose). Do NOT call per step."""
    out_f, in_f = w_base.shape
    num_experts, r, in_f2 = A.shape
    assert in_f2 == in_f
    rank_cols = num_experts * r
    cd = compute_dtype
    wb_t = jnp.asarray(w_base).astype(cd).T                          # (in_f, out_f)
    wr_t = jnp.asarray(w_router).astype(cd).T                        # (in_f, E)
    a_all_t = jnp.asarray(A).astype(cd).reshape(rank_cols, in_f).T   # (in_f, E*r)
    # B: (E, out_f, r) -> (E*r, out_f); kept f32 (tiny; keeps the LoRA path accurate).
    b_all = jnp.transpose(jnp.asarray(B, dtype=jnp.float32),
                          (0, 2, 1)).reshape(rank_cols, out_f)
    bias = jnp.asarray(b_base, dtype=jnp.float32).reshape(1, out_f)
    # (E, E*r) block one-hot: row e has `r` ones at columns e*r .. e*r+r-1, * scale.
    expand = scale * jnp.repeat(jnp.eye(num_experts, dtype=jnp.float32), r, axis=1)
    return dict(wb_t=wb_t, wr_t=wr_t, a_all_t=a_all_t, b_all=b_all, bias=bias,
                expand=expand, compute_dtype=cd, in_f=in_f, out_f=out_f,
                num_experts=num_experts, rank_cols=rank_cols)


def moe_lora_apply(x, params, *, tm=None, tn=None):
    """x: (..., in_f) -> (..., out_f), using pre-arranged params."""
    in_f = params["in_f"]
    out_f = params["out_f"]
    num_experts = params["num_experts"]
    rank_cols = params["rank_cols"]
    cd = params["compute_dtype"]

    leading = x.shape[:-1]
    x_flat = x.reshape(-1, in_f)
    n_tok = x_flat.shape[0]

    cd_bytes = jnp.dtype(cd).itemsize
    out_bytes = jnp.dtype(x.dtype).itemsize
    cap = _vmem_capacity_bytes()
    vmem_limit = int(cap * 0.75)          # ~96 MiB on v5e/v6e, ~48 MiB on v7x
    budget = vmem_limit - (4 << 20)       # headroom for compiler-internal scratch
    tm, tn = _select_tiles(n_tok, out_f, in_f, rank_cols, cd_bytes, out_bytes,
                           budget, tm_req=tm, tn_req=tn)
    assert out_f % tn == 0, "out_features must be divisible by the out tile"

    n_i = pl.cdiv(n_tok, tm)
    n_pad = n_i * tm
    if n_pad != n_tok:
        x_flat = jnp.pad(x_flat, ((0, n_pad - n_tok), (0, 0)))
    x_c = x_flat.astype(cd)
    n_j = out_f // tn

    # Pass 1: gate-scaled rank projection (N, E*r) f32, token tiles only.
    # Router/A/expand index maps are constant -> loaded into VMEM once.
    proj_scaled = pl.pallas_call(
        _router_proj_kernel,
        out_shape=jax.ShapeDtypeStruct((n_pad, rank_cols), jnp.float32),
        grid_spec=pltpu.PrefetchScalarGridSpec(
            num_scalar_prefetch=0,
            grid=(n_i,),
            in_specs=[
                pl.BlockSpec((tm, in_f), lambda i: (i, 0)),                 # x
                pl.BlockSpec((in_f, num_experts), lambda i: (0, 0)),        # W_router^T
                pl.BlockSpec((in_f, rank_cols), lambda i: (0, 0)),          # A_all^T
                pl.BlockSpec((num_experts, rank_cols), lambda i: (0, 0)),   # expand
            ],
            out_specs=pl.BlockSpec((tm, rank_cols), lambda i: (i, 0)),
        ),
        compiler_params=pltpu.CompilerParams(
            dimension_semantics=("parallel",), vmem_limit_bytes=vmem_limit),
    )(x_c, params["wr_t"], params["a_all_t"], params["expand"])

    # Pass 2: out = x @ W_base^T + bias + P @ B_all; out_f outer, tokens inner, so
    # the W_base block index is constant across the inner loop (streamed once).
    # No carried state -> both axes parallel (megacore sharding OK).
    out_flat = pl.pallas_call(
        _base_plus_lora_kernel,
        out_shape=jax.ShapeDtypeStruct((n_pad, out_f), x.dtype),
        grid_spec=pltpu.PrefetchScalarGridSpec(
            num_scalar_prefetch=0,
            grid=(n_j, n_i),
            in_specs=[
                pl.BlockSpec((tm, in_f), lambda j, i: (i, 0)),        # x
                pl.BlockSpec((in_f, tn), lambda j, i: (0, j)),        # W_base^T
                pl.BlockSpec((1, tn), lambda j, i: (0, j)),           # bias
                pl.BlockSpec((rank_cols, tn), lambda j, i: (0, j)),   # B_all
                pl.BlockSpec((tm, rank_cols), lambda j, i: (i, 0)),   # P (rank proj)
            ],
            out_specs=pl.BlockSpec((tm, tn), lambda j, i: (i, j)),
        ),
        compiler_params=pltpu.CompilerParams(
            dimension_semantics=("parallel", "parallel"),
            vmem_limit_bytes=vmem_limit),
    )(x_c, params["wb_t"], params["bias"], params["b_all"], proj_scaled)

    out = out_flat[:n_tok]
    return out.reshape(*leading, out_f)


def moe_lora_linear(x, w_base, b_base, w_router, A, B, *, scale,
                    compute_dtype=jnp.bfloat16, tm=None, tn=None):
    """Convenience wrapper: prepare weights (once) and apply."""
    params = prepare_moe_lora_params(w_base, b_base, w_router, A, B, scale=scale,
                                     compute_dtype=compute_dtype)
    return moe_lora_apply(x, params, tm=tm, tn=tn)


# ---------------------------------------------------------------------------
# Reference + test
# ---------------------------------------------------------------------------

def _reference(x, w_base, b_base, w_router, A, B, *, scale):
    """Pure-JAX transcription of MoELoRALinear.forward (dropout = identity)."""
    xf = x.astype(jnp.float32)
    base_out = xf @ w_base.T + b_base
    gates = jax.nn.softmax(xf @ w_router.T, axis=-1)                      # (..., E)
    proj_r = jnp.einsum('...i,eri->...er', xf, A)                         # (..., E, r)
    lora_out = jnp.einsum('...er,eor->...eo', proj_r, B)                  # (..., E, out_f)
    weighted = (gates * scale)[..., None] * lora_out
    lora_mix = weighted.sum(axis=-2)
    return (base_out + lora_mix).astype(x.dtype)


def _make_inputs(key, batch, seq, in_f, out_f, r, num_experts):
    kx, kw, kb, kr, ka, kbb = jax.random.split(key, 6)
    x = jax.random.normal(kx, (batch, seq, in_f), dtype=jnp.float32)
    bound = 1.0 / math.sqrt(in_f)
    w_base = jax.random.uniform(kw, (out_f, in_f), minval=-bound, maxval=bound,
                                dtype=jnp.float32)
    b_base = jax.random.uniform(kb, (out_f,), minval=-bound, maxval=bound,
                                dtype=jnp.float32)
    # Module zero-inits router and B; use small random values so those paths are
    # exercised numerically.
    w_router = 0.1 * jax.random.normal(kr, (num_experts, in_f), dtype=jnp.float32)
    A = jax.random.uniform(ka, (num_experts, r, in_f), minval=-bound, maxval=bound,
                           dtype=jnp.float32)
    B = 0.02 * jax.random.normal(kbb, (num_experts, out_f, r), dtype=jnp.float32)
    return x, w_base, b_base, w_router, A, B


if __name__ == "__main__":
    r, alpha, num_experts = 8, 16, 4
    scale = alpha / r
    key = jax.random.PRNGKey(0)
    k1, k2 = jax.random.split(key)

    # Case 1: small module-consistent shapes; single tile.
    batch, seq, in_f, out_f = 2, 8, 32, 32
    x, w_base, b_base, w_router, A, B = _make_inputs(k1, batch, seq, in_f, out_f,
                                                     r, num_experts)
    ref = _reference(x, w_base, b_base, w_router, A, B, scale=scale)

    # Exact fp32 path (matches the PyTorch module's fp32 math).
    params_f32 = prepare_moe_lora_params(w_base, b_base, w_router, A, B,
                                         scale=scale, compute_dtype=jnp.float32)
    out_f32 = jax.block_until_ready(moe_lora_apply(x, params_f32))
    assert out_f32.shape == (batch, seq, out_f)
    assert jnp.allclose(out_f32, ref, atol=2e-4, rtol=2e-4), \
        f"fp32 max abs err {jnp.max(jnp.abs(out_f32 - ref))}"

    # Default bf16 MXU path (f32 accumulation): looser tolerance.
    params_bf16 = prepare_moe_lora_params(w_base, b_base, w_router, A, B,
                                          scale=scale)   # compute_dtype=bf16 default
    out_bf16 = jax.block_until_ready(moe_lora_apply(x, params_bf16))
    assert jnp.allclose(out_bf16, ref, atol=5e-2, rtol=5e-2), \
        f"bf16 max abs err {jnp.max(jnp.abs(out_bf16 - ref))}"

    # Case 2: multi-tile grid (2 token tiles with padding x 2 out_f tiles), fp32.
    batch2, seq2, in_f2, out_f2 = 2, 9, 64, 256
    x2, w_base2, b_base2, w_router2, A2, B2 = _make_inputs(
        k2, batch2, seq2, in_f2, out_f2, r, num_experts)
    ref2 = _reference(x2, w_base2, b_base2, w_router2, A2, B2, scale=scale)
    out2 = moe_lora_linear(x2, w_base2, b_base2, w_router2, A2, B2, scale=scale,
                           compute_dtype=jnp.float32, tm=16, tn=128)
    out2 = jax.block_until_ready(out2)
    assert out2.shape == (batch2, seq2, out_f2)
    assert jnp.allclose(out2, ref2, atol=2e-4, rtol=2e-4), \
        f"multi-tile fp32 max abs err {jnp.max(jnp.abs(out2 - ref2))}"

    print("KERNEL_OK")
</pallas_src>

<mosaic_0001>
module attributes {stable_mosaic.version = 11 : i64} {
  func.func @_router_proj_kernel(%arg0: i32, %arg1: memref<16x32xf32, #tpu.memory_space<vmem>>, %arg2: memref<32x4xf32, #tpu.memory_space<vmem>>, %arg3: memref<32x32xf32, #tpu.memory_space<vmem>>, %arg4: memref<4x32xf32, #tpu.memory_space<vmem>>, %arg5: memref<16x32xf32, #tpu.memory_space<vmem>>) attributes {dimension_semantics = [#tpu.dimension_semantics<parallel>], iteration_bounds = array<i64: 1>, scalar_prefetch = 0 : i64, scratch_operands = 0 : i64, tpu.core_type = #tpu.core_type<tc>, window_params = [{transform_indices = @transform_0, window_bounds = array<i64: 16, 32>}, {pipeline_mode = #tpu.pipeline_mode<synchronous>, transform_indices = @transform_1, window_bounds = array<i64: 32, 4>}, {pipeline_mode = #tpu.pipeline_mode<synchronous>, transform_indices = @transform_2, window_bounds = array<i64: 32, 32>}, {pipeline_mode = #tpu.pipeline_mode<synchronous>, transform_indices = @transform_3, window_bounds = array<i64: 4, 32>}, {transform_indices = @transform_4, window_bounds = array<i64: 16, 32>}]} {
    %c0 = arith.constant 0 : index
    %c0_0 = arith.constant 0 : index
    %0 = vector.load %arg1[%c0, %c0_0] : memref<16x32xf32, #tpu.memory_space<vmem>>, vector<16x32xf32>
    %c0_1 = arith.constant 0 : index
    %c0_2 = arith.constant 0 : index
    %1 = vector.load %arg2[%c0_1, %c0_2] : memref<32x4xf32, #tpu.memory_space<vmem>>, vector<32x4xf32>
    %cst = arith.constant dense<0.000000e+00> : vector<16x4xf32>
    %2 = tpu.matmul %0, %1, %cst {dimension_numbers = #tpu.dot_dimension_numbers<[1], [0], [0], [1], [0, 0, 1, 1], [], []>} : vector<16x32xf32>, vector<32x4xf32>, vector<16x4xf32> -> vector<16x4xf32>
    %cst_3 = arith.constant dense<0xFF800000> : vector<16xf32>
    %3 = vector.multi_reduction <maximumf>, %2, %cst_3 [1] : vector<16x4xf32> to vector<16xf32>
    %4 = vector.shape_cast %3 : vector<16xf32> to vector<16x1xf32>
    %5 = vector.broadcast %4 : vector<16x1xf32> to vector<16x4xf32>
    %6 = arith.subf %2, %5 : vector<16x4xf32>
    %7 = math.exp %6 : vector<16x4xf32>
    %cst_4 = arith.constant dense<0.000000e+00> : vector<16xf32>
    %8 = vector.multi_reduction <add>, %7, %cst_4 [1] : vector<16x4xf32> to vector<16xf32>
    %9 = vector.shape_cast %8 : vector<16xf32> to vector<16x1xf32>
    %10 = tpu.reciprocal %9 : vector<16x1xf32> -> vector<16x1xf32>
    %11 = vector.broadcast %10 : vector<16x1xf32> to vector<16x4xf32>
    %12 = arith.mulf %7, %11 : vector<16x4xf32>
    %c0_5 = arith.constant 0 : index
    %c0_6 = arith.constant 0 : index
    %13 = vector.load %arg3[%c0_5, %c0_6] : memref<32x32xf32, #tpu.memory_space<vmem>>, vector<32x32xf32>
    %cst_7 = arith.constant dense<0.000000e+00> : vector<16x32xf32>
    %14 = tpu.matmul %0, %13, %cst_7 {dimension_numbers = #tpu.dot_dimension_numbers<[1], [0], [0], [1], [0, 0, 1, 1], [], []>} : vector<16x32xf32>, vector<32x32xf32>, vector<16x32xf32> -> vector<16x32xf32>
    %c0_8 = arith.constant 0 : index
    %c0_9 = arith.constant 0 : index
    %15 = vector.load %arg4[%c0_8, %c0_9] : memref<4x32xf32, #tpu.memory_space<vmem>>, vector<4x32xf32>
    %cst_10 = arith.constant dense<0.000000e+00> : vector<16x32xf32>
    %16 = tpu.matmul %12, %15, %cst_10 {dimension_numbers = #tpu.dot_dimension_numbers<[1], [0], [0], [1], [0, 0, 1, 1], [], []>} : vector<16x4xf32>, vector<4x32xf32>, vector<16x32xf32> -> vector<16x32xf32>
    %17 = arith.mulf %14, %16 : vector<16x32xf32>
    %c0_11 = arith.constant 0 : index
    %c0_12 = arith.constant 0 : index
    %18 = vector.load %arg5[%c0_11, %c0_12] : memref<16x32xf32, #tpu.memory_space<vmem>>, vector<16x32xf32>
    tpu.vector_store %arg5[%c0_11, %c0_12], %17 {strides = array<i32>} : memref<16x32xf32, #tpu.memory_space<vmem>>, vector<16x32xf32>,
    return
  }
  func.func @transform_0(%arg0: i32) -> (i32, i32) {
    %c0_i32 = arith.constant 0 : i32
    %c0_i32_0 = arith.constant 0 : i32
    return %arg0, %c0_i32 : i32, i32
  }
  func.func @transform_1(%arg0: i32) -> (i32, i32) {
    %c0_i32 = arith.constant 0 : i32
    %c0_i32_0 = arith.constant 0 : i32
    %c0_i32_1 = arith.constant 0 : i32
    return %c0_i32, %c0_i32_0 : i32, i32
  }
  func.func @transform_2(%arg0: i32) -> (i32, i32) {
    %c0_i32 = arith.constant 0 : i32
    %c0_i32_0 = arith.constant 0 : i32
    %c0_i32_1 = arith.constant 0 : i32
    return %c0_i32, %c0_i32_0 : i32, i32
  }
  func.func @transform_3(%arg0: i32) -> (i32, i32) {
    %c0_i32 = arith.constant 0 : i32
    %c0_i32_0 = arith.constant 0 : i32
    %c0_i32_1 = arith.constant 0 : i32
    return %c0_i32, %c0_i32_0 : i32, i32
  }
  func.func @transform_4(%arg0: i32) -> (i32, i32) {
    %c0_i32 = arith.constant 0 : i32
    %c0_i32_0 = arith.constant 0 : i32
    return %arg0, %c0_i32 : i32, i32
  }
}

</mosaic_0001>

<bundles_post_ra>
// kernel: tpu_custom_call.1
= control target key start
LH: loop header
LB: loop body
LE: loop exit
PB: predicated region body
PF: predicated region fallthrough
CT: control target
= control target key end

     0   :  { %9 = vsyncpa [#allocation3], 0  ;;  %s514_s0 = inlined_call_operand.hbm [shape: f32[16,32], index: 0, kind: input, shape index: {}]   ;;  %s515_s1 = inlined_call_operand.vmem [shape: f32[32,4], index: 1, kind: input, shape index: {}]   ;;  %s516_s2 = inlined_call_operand.vmem [shape: f32[32,32], index: 2, kind: input, shape index: {}]   ;;  %s517_s3 = inlined_call_operand.vmem [shape: f32[4,32], index: 3, kind: input, shape index: {}]   ;;  %s518_s4 = inlined_call_operand.hbm [shape: f32[16,32], index: 4, kind: output, shape index: {}]  }
   0x1   :  { %10 = vsyncpa [#allocation4], 0  ;;  %s434_s15 = smov [#allocation2]  }
   0x2   :  { %s16_s16 = sshll.u32 %s434_s15, 4  ;;  %s17_s16 = int_to_ptr.vmem [resolvable:$true] %s16_s16 }
   0x3   :  { %s398_s17 = scalar_lea.vmem %s17_s16, 256  ;;  %p403_p1 = scmp.lt.s32.totalorder %s17_s16, %s17_s16 }
   0x4   :  { %p399_p0 = scmp.ne.s32.totalorder %s17_s16, %s398_s17  ;;  %p404_p2 = scmp.lt.s32.totalorder %s398_s17, %s398_s17 }
   0x6   :  { %p405_p3 = por %p404_p2, %p403_p1 }
   0x8   :  { %p406_p4 = pnand %p405_p3, %p399_p0 }
   0xa   :  { %409 = shalt.err (!%p406_p4)
}
   0xb   :  { %s435_s18 = smov 128   ;;  %s436_s19 = smov 8  }
   0xc   :  { %22 = dma.hbm_to_vmem [thread:$0]  %s514_s0, 256, %s17_s16, [#allocation3], %s435_s18, %s435_s18, %s436_s19  }
   0xd   :  { %430 = dma.done.wait [#allocation3], 256  }
   0xe   :  { %431 = vsyncadd [#allocation3], 4294967040  ;;  %vm38_vm0 = vcmask 261120   ;;  %v37_v0 = vld [vmem:[%s515_s1 + $0x18] sm:$0xff]  ;;  %v36_v1 = vld [vmem:[%s515_s1 + $0x10] sm:$0xff]  ;;  %vm120_vm1 = vcmask 31744  }
   0xf   :  { %351 = vmatprep.subr.mxu0 %v37_v0  ;;  %v32_v2 = vld [vmem:[#allocation2] sm:$0xff]  ;;  %v35_v3 = vld [vmem:[%s515_s1 + $0x8] sm:$0xff]  ;;  %v146_v20 = vld [vmem:[%s516_s2 + $0x18] sm:$0xff]  ;;  %vm229_vm2 = vcmask 1043456  }
  0x10   :  { %352 = vmatpush3.msra.mxu0 %v37_v0  ;;  %359 = vmatprep.mubr.msk.f32.mxu0 %vm38_vm0, %v32_v2  ;;  %v34_v4 = vld [vmem:[%s515_s1] sm:$0xff]  ;;  %v33_v5 = vld [vmem:[#allocation2 + $0x8] sm:$0xff]  ;;  %v145_v21 = vld [vmem:[%s516_s2 + $0x10] sm:$0xff] }
  0x11   :  { %353 = vmatprep.subr.mxu0 %v36_v1  ;;  %370 = vmatprep.mubr.msk.f32.mxu1 %vm38_vm0, %v32_v2  ;;  %v222_v22 = vld [vmem:[%s517_s3] sm:$0xf]  ;;  %v144_v23 = vld [vmem:[%s516_s2 + $0x8] sm:$0xff] }
  0x12   :  { %354 = vmatpush3.msra.mxu0 %v36_v1  ;;  %362 = vmatprep.subr.mxu1 %v146_v20  ;;  %v143_v24 = vld [vmem:[%s516_s2] sm:$0xff]  ;;  %s437_s2 = smov [#allocation5]  }
  0x13   :  { %355 = vmatprep.subr.mxu0 %v35_v3  ;;  %363 = vmatpush3.msra.mxu1 %v146_v20  ;;  %s317_s3 = sshll.u32 %s437_s2, 4  ;;  %s318_s3 = int_to_ptr.vmem [resolvable:$true] %s317_s3 }
  0x14   :  { %356 = vmatpush3.msra.mxu0 %v35_v3  ;;  %364 = vmatprep.subr.mxu1 %v145_v21  ;;  %s410_s12 = scalar_lea.vmem %s318_s3, 256  ;;  %p415_p6 = scmp.lt.s32.totalorder %s318_s3, %s318_s3 }
  0x15   :  { %357 = vmatprep.subr.mxu0 %v34_v4  ;;  %365 = vmatpush3.msra.mxu1 %v145_v21  ;;  %p411_p5 = scmp.ne.s32.totalorder %s318_s3, %s410_s12  ;;  %p416_p7 = scmp.lt.s32.totalorder %s410_s12, %s410_s12 }
  0x16   :  { %358 = vmatpush3.msra.mxu0 %v34_v4  ;;  %366 = vmatprep.subr.mxu1 %v144_v23 }
  0x17   :  { %360 = vmatmul.mubr.msk.f32.vlgmr.msra.gmra.mxu0 %vm38_vm0, %v33_v5  ;;  %373 = vmatprep.subr.msk.mxu0 %vm229_vm2, %v222_v22  ;;  %p417_p8 = por %p416_p7, %p415_p6 }
  0x18   :  { %374 = vmatpush3.msk.msra.mxu0 %vm229_vm2, %v222_v22  ;;  %367 = vmatpush3.msra.mxu1 %v144_v23 }
  0x19   :  { %368 = vmatprep.subr.mxu1 %v143_v24  ;;  %p418_p9 = pnand %p417_p8, %p411_p5 }
  0x1a   :  { %369 = vmatpush3.msra.mxu1 %v143_v24 }
  0x1b   :  { %371 = vmatmul.mubr.msk.f32.vlgmr.msra.gmra.mxu1 %vm38_vm0, %v33_v5 }
  0xd7   :  { %v361_v6 = vpop.f32.mrf.mxu0 }
  0xd8   :  { %v124_v9 = vsel %vm120_vm1, %v361_v6, -inf }
  0xd9   :  { %v111_v7 = vpop.f32.mrf.mxu0 }
  0xda   :  { %v121_v8 = vsel %vm120_vm1, %v111_v7, -inf }
  0xdb   :  { %122 = vmax.xlane.f32.xlu0 %v121_v8  ;;  %v372_v31 = vpop.f32.mrf.mxu1 }
  0xdd   :  { %v213_v34 = vpop.f32.mrf.mxu1 }
  0xdf   :  { %125 = vmax.xlane.f32.xlu0 %v124_v9 }
 0x164   :  { %v123_v10 = vpop.xlane.xlu0 %122 }
 0x165   :  { %v127_v11 = vsub.f32 %v111_v7, %v123_v10 }
 0x167   :  { %v129_v12 = vmul.f32 1.442695, %v127_v11 }
 0x168   :  { %v126_v13 = vpop.xlane.xlu0 %125 }
 0x169   :  { %382 = vpow2.f32 %v129_v12  ;;  %v128_v14 = vsub.f32 %v361_v6, %v126_v13 }
 0x16b   :  { %v131_v15 = vmul.f32 1.442695, %v128_v14 }
 0x16d   :  { %384 = vpow2.f32 %v131_v15 }
 0x176   :  { %v383_v16 = vpop.eup %382 }
 0x177   :  { %v133_v17 = vsel %vm120_vm1, %v383_v16, 0.0 }
 0x178   :  { %134 = vadd.xlane.f32.xlu1 %v133_v17 }
 0x17a   :  { %v385_v18 = vpop.eup %384 }
 0x17b   :  { %v136_v19 = vsel %vm120_vm1, %v385_v18, 0.0 }
 0x17c   :  { %137 = vadd.xlane.f32.xlu1 %v136_v19 }
 0x201   :  { %v135_v25 = vpop.xlane.xlu1 %134 }
 0x202   :  { %386 = vrcp.f32 %v135_v25 }
 0x205   :  { %v138_v26 = vpop.xlane.xlu1 %137 }
 0x206   :  { %388 = vrcp.f32 %v138_v26 }
 0x20f   :  { %v387_v27 = vpop.eup %386 }
 0x210   :  { %v141_v28 = vmul.f32 %v387_v27, %v383_v16 }
 0x212   :  { %375 = vmatprep.mubr.msk.f32.mxu0 %vm120_vm1, %v141_v28 }
 0x213   :  { %v389_v29 = vpop.eup %388 }
 0x214   :  { %v142_v30 = vmul.f32 %v389_v29, %v385_v18 }
 0x216   :  { %376 = vmatmul.mubr.msk.f32.vlgmr.msra.gmra.mxu0 %vm120_vm1, %v142_v30 }
 0x2d6   :  { %v377_v32 = vpop.f32.mrf.mxu0 }
 0x2d7   :  { %v309_v33 = vmul.f32 %v377_v32, %v372_v31 }
 0x2d8   :  { %v299_v35 = vpop.f32.mrf.mxu0 }
 0x2d9   :  { %311 = vst.msk [vmem:[#allocation5 + $0x8] sm:$0xff] %vm38_vm0, %v309_v33  ;;  %v308_v36 = vmul.f32 %v299_v35, %v213_v34 }
 0x2db   :  { %310 = vst.msk [vmem:[#allocation5] sm:$0xff] %vm38_vm0, %v308_v36 }
 0x2dc   :  { %421 = shalt.err (!%p418_p9)
}
 0x2dd   :  { %323 = dma.vmem_to_hbm [thread:$0]  %s318_s3, 256, %s518_s4, [#allocation4], %s435_s18, %s435_s18, %s436_s19  }
 0x2de   :  { %432 = dma.done.wait [#allocation4], 256  }
 0x2df   :  { %433 = vsyncadd [#allocation4], 4294967040 }
 0x2e0   :  { %327 = vsyncpa [#allocation3], 1 }
 0x2e1   :  { %328 = vsyncpa [#allocation4], 1 }

</bundles_post_ra>
